<compile_context>
chip_gen: v6e
topology: v6e:2x2x1
jax: 0.10.0
libtpu: 0.0.40
codegen_flags: <defaults>
</compile_context>

<pallas_src>
import functools
import math

import jax
import jax.numpy as jnp
from jax.experimental import pallas as pl
from jax.experimental.pallas import tpu as pltpu


# ----------------------------------------------------------------------------
# Static helper matrices (tiny; built at trace time from static shapes)
# ----------------------------------------------------------------------------
def _adaptive_pool_matrix(in_size, out_size):
    """P (out_size, in_size): PyTorch AdaptiveAvgPool2d window means as a matrix."""
    rows = []
    for i in range(out_size):
        s = (i * in_size) // out_size
        e = math.ceil((i + 1) * in_size / out_size)
        row = [0.0] * in_size
        inv = 1.0 / (e - s)
        for k in range(s, e):
            row[k] = inv
        rows.append(row)
    return jnp.asarray(rows, dtype=jnp.float32)


def _interp_matrix(out_size, in_size):
    """W (out_size, in_size): 1-D bilinear weights, align_corners=True."""
    if out_size == 1 or in_size == 1:
        m = jnp.zeros((out_size, in_size), jnp.float32)
        return m.at[:, 0].set(1.0)
    src = jnp.arange(out_size, dtype=jnp.float32) * (in_size - 1) / (out_size - 1)
    i0 = jnp.floor(src).astype(jnp.int32)
    i1 = jnp.minimum(i0 + 1, in_size - 1)
    frac = src - i0.astype(jnp.float32)
    rows = jnp.arange(out_size)
    m = jnp.zeros((out_size, in_size), jnp.float32)
    m = m.at[rows, i0].add(1.0 - frac)
    m = m.at[rows, i1].add(frac)
    return m


# ----------------------------------------------------------------------------
# Fused Pallas kernel: copy input channels + all upsampled pyramids in one matmul
# ----------------------------------------------------------------------------
def _make_psp_kernel(cin, tm, m_resident):
    def kernel(x_ref, m_ref, f_ref, o_ref):
        # x_ref: (Cin, TM)                 input channels for this pixel tile
        # m_ref: (Ktot, M_pad) [resident]  or (Ktot, TM) [streamed] bilinear weights
        # f_ref: (S*Cout, Ktot)            block-diagonal post-ReLU stage features
        # o_ref: (Cin+S*Cout, TM)          concatenated output tile (input dtype)
        o_ref[:cin, :] = x_ref[...]
        if m_resident:
            start = pl.multiple_of(pl.program_id(1) * tm, 128)
            m_tile = m_ref[:, pl.ds(start, tm)]
        else:
            m_tile = m_ref[...]
        pyr = jnp.dot(f_ref[...], m_tile, preferred_element_type=jnp.float32)
        o_ref[cin:, :] = pyr.astype(o_ref.dtype)
    return kernel


def _vmem_capacity_bytes():
    try:
        return int(pltpu.get_tpu_info().vmem_capacity_bytes)
    except Exception:
        return 64 * 1024 * 1024        # conservative fallback (v7x per-TC VMEM)


def _choose_tile(M, cin, ctotal, ktot, spy, itemsize, n_batch, vmem_budget):
    """Largest lane-dense pixel tile (multiple of 128, <=1024) whose double-buffered
    working set fits the VMEM budget, preferring >=2 grid steps and small padding.
    Also decides whether m_t stays VMEM-resident."""
    m_ceil128 = ((M + 127) // 128) * 128
    cap = min(1024, m_ceil128)
    for cand in range(cap, 0, -128):
        m_pad = ((M + cand - 1) // cand) * cand
        m_res_bytes = 2 * ktot * m_pad * itemsize
        m_resident = m_res_bytes <= (4 << 20)
        m_bytes = m_res_bytes if m_resident else 2 * ktot * cand * itemsize
        need = (2 * (cin + ctotal) * cand + 2 * spy * ktot) * itemsize + m_bytes
        fits = need <= vmem_budget
        enough_steps = n_batch * ((M + cand - 1) // cand) >= 2
        pad_ok = (m_pad - M) * 8 <= M          # <= 12.5% padding overhead
        if (fits and enough_steps and pad_ok) or cand == 128:
            return cand, m_pad, m_resident, need
    return 128, m_ceil128, True, 0             # unreachable


def _psp_fused(x_flat, m_t, f_bd, ctotal):
    """x_flat: (N, Cin, M); m_t: (Ktot, M); f_bd: (N, S*Cout, Ktot) -> (N, Ctotal, M)."""
    N, cin, M = x_flat.shape
    ktot = m_t.shape[0]
    spy = f_bd.shape[1]
    dtype = x_flat.dtype
    itemsize = jnp.dtype(dtype).itemsize

    vmem_cap = _vmem_capacity_bytes()
    tm, m_pad, m_resident, need = _choose_tile(
        M, cin, ctotal, ktot, spy, itemsize, N, int(0.4 * vmem_cap))

    if m_pad != M:
        x_flat = jnp.pad(x_flat, ((0, 0), (0, 0), (0, m_pad - M)))
        m_t = jnp.pad(m_t, ((0, 0), (0, m_pad - M)))

    grid = (N, m_pad // tm)

    if m_resident:
        # Constant block index => fetched into VMEM once, no re-DMA per grid step.
        m_spec = pl.BlockSpec((ktot, m_pad), lambda n, t: (0, 0))
    else:
        m_spec = pl.BlockSpec((ktot, tm), lambda n, t: (0, t))

    cost = pl.CostEstimate(
        flops=int(2 * spy * ktot * m_pad * N),
        transcendentals=0,
        bytes_accessed=int((N * cin * m_pad + ktot * m_pad + N * spy * ktot
                            + N * ctotal * m_pad) * itemsize),
    )
    # Raise the scoped VMEM limit only as far as the working set needs (v5e/v6e
    # defaults are 16/32 MiB); never exceed ~90% of physical VMEM (v7x = 64 MiB).
    vmem_limit = int(min(int(0.9 * vmem_cap), max(need + (16 << 20), 32 << 20)))

    out = pl.pallas_call(
        _make_psp_kernel(cin, tm, m_resident),
        out_shape=jax.ShapeDtypeStruct((N, ctotal, m_pad), dtype),
        grid_spec=pltpu.PrefetchScalarGridSpec(
            num_scalar_prefetch=0,
            grid=grid,
            in_specs=[
                pl.BlockSpec((None, cin, tm), lambda n, t: (n, 0, t)),
                m_spec,
                pl.BlockSpec((None, spy, ktot), lambda n, t: (n, 0, 0)),
            ],
            out_specs=pl.BlockSpec((None, ctotal, tm), lambda n, t: (n, 0, t)),
        ),
        compiler_params=pltpu.CompilerParams(
            dimension_semantics=("parallel", "parallel"),
            vmem_limit_bytes=vmem_limit),
        cost_estimate=cost,
    )(x_flat, m_t, f_bd)

    return out[:, :, :M] if m_pad != M else out


# ----------------------------------------------------------------------------
# PSP forward (Pallas)
# ----------------------------------------------------------------------------
def psp_forward_pallas(x_nchw, params, pool_sizes):
    x = x_nchw                                     # keep original dtype (no upcast)
    N, Cin, H, W = x.shape
    S = len(pool_sizes)
    Cout = Cin // S
    M = H * W
    Ctotal = Cin + S * Cout

    x_flat = x.reshape(N, Cin, M)                  # free reshape, layout preserved

    # --- stacked pooling / interpolation matrices (constants under jit) ------
    ks = [p * p for p in pool_sizes]
    Ktot = sum(ks)
    pool_rows, interp_rows = [], []
    for p in pool_sizes:
        Py = _adaptive_pool_matrix(H, p)           # (p, H)
        Px = _adaptive_pool_matrix(W, p)           # (p, W)
        pool_rows.append(jnp.einsum('iy,jx->ijyx', Py, Px).reshape(p * p, M))
        Wy = _interp_matrix(H, p)                  # (H, p)
        Wx = _interp_matrix(W, p)                  # (W, p)
        interp_rows.append(jnp.einsum('yi,xj->ijyx', Wy, Wx).reshape(p * p, M))
    m_pool = jnp.concatenate(pool_rows, axis=0)    # (Ktot, M)
    m_t = jnp.concatenate(interp_rows, axis=0)     # (Ktot, M)

    # --- ONE pooling contraction over x for all S stages ---------------------
    pooled_all = jnp.einsum('ncm,km->nck', x_flat, m_pool,
                            preferred_element_type=jnp.float32)   # (N, Cin, Ktot)

    # --- tiny per-stage 1x1 conv + BN(eval) + ReLU (<=6x6 grids, plain JAX) ---
    Spy = S * Cout
    f_bd = jnp.zeros((N, Spy, Ktot), jnp.float32)  # block-diagonal stage features
    off = 0
    for s, p in enumerate(pool_sizes):
        seg = pooled_all[:, :, off:off + ks[s]]                       # (N, Cin, k)
        y = jnp.einsum('nck,cd->ndk', seg, params[f"w{s}"])           # (N, Cout, k)
        y = jnp.maximum(y * params[f"s{s}"][None, :, None]
                        + params[f"b{s}"][None, :, None], 0.0)
        f_bd = f_bd.at[:, s * Cout:(s + 1) * Cout, off:off + ks[s]].set(y)
        off += ks[s]

    out_flat = _psp_fused(x_flat, m_t.astype(x.dtype), f_bd.astype(x.dtype), Ctotal)
    return out_flat.reshape(N, Ctotal, H, W)       # free reshape -> NCHW output


# ----------------------------------------------------------------------------
# Pure-JAX reference (independent code path) for validation
# ----------------------------------------------------------------------------
def _bilinear_upsample_align_corners(f, H, W):
    """f: (N, h, w, C) -> (N, H, W, C), matches F.interpolate(align_corners=True)."""
    _, h, w, _ = f.shape

    def axis(out_size, in_size):
        if out_size == 1 or in_size == 1:
            z = jnp.zeros((out_size,), jnp.int32)
            return z, z, jnp.zeros((out_size,), jnp.float32)
        src = jnp.arange(out_size, dtype=jnp.float32) * (in_size - 1) / (out_size - 1)
        i0 = jnp.floor(src).astype(jnp.int32)
        i1 = jnp.minimum(i0 + 1, in_size - 1)
        return i0, i1, src - i0.astype(jnp.float32)

    y0, y1, fy = axis(H, h)
    x0, x1, fx = axis(W, w)
    fy = fy[None, :, None, None]
    fx = fx[None, None, :, None]
    rows = f[:, y0, :, :] * (1.0 - fy) + f[:, y1, :, :] * fy      # (N, H, w, C)
    return rows[:, :, x0, :] * (1.0 - fx) + rows[:, :, x1, :] * fx


def psp_forward_reference(x_nchw, params, pool_sizes):
    x = jnp.transpose(x_nchw, (0, 2, 3, 1)).astype(jnp.float32)   # NHWC
    N, H, W, Cin = x.shape
    S = len(pool_sizes)
    Cout = Cin // S
    outs = [x]
    for s, p in enumerate(pool_sizes):
        rows = []
        for i in range(p):
            ys, ye = (i * H) // p, math.ceil((i + 1) * H / p)
            cols = []
            for j in range(p):
                xs, xe = (j * W) // p, math.ceil((j + 1) * W / p)
                cols.append(jnp.mean(x[:, ys:ye, xs:xe, :], axis=(1, 2)))
            rows.append(jnp.stack(cols, axis=1))
        pooled = jnp.stack(rows, axis=1)                           # (N, p, p, Cin)
        y = jnp.einsum('nijc,cd->nijd', pooled, params[f"w{s}"])
        y = jnp.maximum(y * params[f"s{s}"].reshape(1, 1, 1, -1)
                        + params[f"b{s}"].reshape(1, 1, 1, -1), 0.0)
        outs.append(_bilinear_upsample_align_corners(y, H, W))
    out = jnp.concatenate(outs, axis=-1)
    return jnp.transpose(out, (0, 3, 1, 2))                        # NCHW


# ----------------------------------------------------------------------------
# Deterministic parameter construction (mimics the nn.Module shapes, eval mode)
# ----------------------------------------------------------------------------
def _fold_bn(gamma, beta, mean, var, eps=1e-5):
    scale = gamma / jnp.sqrt(var + eps)
    bias = beta - mean * scale
    return scale, bias


def make_params(key, in_channels, pool_sizes):
    S = len(pool_sizes)
    out_channels = in_channels // S
    keys = jax.random.split(key, 5 * S)
    p = {}
    for s in range(S):
        kw, kg, kb, km, kv = keys[5 * s:5 * s + 5]
        p[f"w{s}"] = jax.random.normal(kw, (in_channels, out_channels)) * (
            1.0 / jnp.sqrt(in_channels))
        gamma = 0.5 + jax.random.uniform(kg, (out_channels,))
        beta = 0.1 * jax.random.normal(kb, (out_channels,))
        mean = 0.1 * jax.random.normal(km, (out_channels,))
        var = 0.5 + jax.random.uniform(kv, (out_channels,))
        p[f"s{s}"], p[f"b{s}"] = _fold_bn(gamma, beta, mean, var)
    return p


# ----------------------------------------------------------------------------
if __name__ == "__main__":
    N, Cin, H, W = 2, 16, 16, 16
    pool_sizes = (1, 2, 3, 6)      # classic PSP pyramid; out_channels = Cin // 4 = 4

    key = jax.random.PRNGKey(0)
    kx, kp = jax.random.split(key)
    x = jax.random.normal(kx, (N, Cin, H, W), dtype=jnp.float32)   # NCHW input
    params = make_params(kp, Cin, pool_sizes)

    fwd = jax.jit(functools.partial(psp_forward_pallas, pool_sizes=pool_sizes))
    out = jax.block_until_ready(fwd(x, params))

    S = len(pool_sizes)
    Cout = Cin // S
    assert out.shape == (N, Cin + S * Cout, H, W), out.shape
    assert out.dtype == x.dtype, out.dtype

    ref = jax.block_until_ready(psp_forward_reference(x, params, pool_sizes))
    max_err = float(jnp.max(jnp.abs(out - ref)))
    assert max_err < 1e-2, f"f32 max abs error vs reference: {max_err}"

    # bf16 path: no forced upcast, output dtype follows input dtype (half HBM traffic)
    xb = x.astype(jnp.bfloat16)
    out_b = jax.block_until_ready(fwd(xb, params))
    assert out_b.dtype == jnp.bfloat16, out_b.dtype
    ref_b = psp_forward_reference(xb.astype(jnp.float32), params, pool_sizes)
    max_err_b = float(jnp.max(jnp.abs(out_b.astype(jnp.float32) - ref_b)))
    assert max_err_b < 0.3, f"bf16 max abs error vs reference: {max_err_b}"

    print("KERNEL_OK")
</pallas_src>

<mosaic_0001>
module attributes {stable_mosaic.version = 11 : i64} {
  func.func private @main(%arg0: i32) attributes {dimension_semantics = [#tpu.dimension_semantics<core_parallel>], iteration_bounds = array<i64: 2>, tpu.core_type = #tpu.core_type<sc_scalar_subcore>, window_params = []} {
    return
  }
}

module attributes {stable_mosaic.version = 11 : i64} {
  func.func private @main(%arg0: i32) attributes {dimension_semantics = [#tpu.dimension_semantics<core_parallel>], iteration_bounds = array<i64: 2>, tpu.core_type = #tpu.core_type<sc_scalar_subcore>, window_params = []} {
    return
  }
}

module attributes {stable_mosaic.version = 11 : i64} {
  func.func @kernel(%arg0: i32, %arg1: i32, %arg2: memref<1x16x256xf32, #tpu.memory_space<vmem>>, %arg3: memref<50x256xf32, #tpu.memory_space<vmem>>, %arg4: memref<1x16x50xf32, #tpu.memory_space<vmem>>, %arg5: memref<1x32x256xf32, #tpu.memory_space<vmem>>) attributes {dimension_semantics = [#tpu.dimension_semantics<parallel>, #tpu.dimension_semantics<parallel>], iteration_bounds = array<i64: 2, 1>, scalar_prefetch = 0 : i64, scratch_operands = 0 : i64, tpu.core_type = #tpu.core_type<tc>, window_params = [{transform_indices = @transform_0, window_bounds = array<i64: 1, 16, 256>}, {pipeline_mode = #tpu.pipeline_mode<synchronous>, transform_indices = @transform_1, window_bounds = array<i64: 50, 256>}, {transform_indices = @transform_2, window_bounds = array<i64: 1, 16, 50>}, {transform_indices = @transform_3, window_bounds = array<i64: 1, 32, 256>}]} {
    %c0 = arith.constant 0 : index
    %c0_0 = arith.constant 0 : index
    %c0_1 = arith.constant 0 : index
    %0 = vector.load %arg2[%c0, %c0_0, %c0_1] : memref<1x16x256xf32, #tpu.memory_space<vmem>>, vector<1x16x256xf32>
    %1 = vector.shape_cast %0 : vector<1x16x256xf32> to vector<16x256xf32>
    %c0_2 = arith.constant 0 : index
    %c0_3 = arith.constant 0 : index
    %c0_4 = arith.constant 0 : index
    %2 = vector.load %arg5[%c0_2, %c0_3, %c0_4] : memref<1x32x256xf32, #tpu.memory_space<vmem>>, vector<1x16x256xf32>
    %3 = vector.shape_cast %2 : vector<1x16x256xf32> to vector<16x256xf32>
    %4 = vector.shape_cast %1 : vector<16x256xf32> to vector<1x16x256xf32>
    tpu.vector_store %arg5[%c0_2, %c0_3, %c0_4], %4 {strides = array<i32>} : memref<1x32x256xf32, #tpu.memory_space<vmem>>, vector<1x16x256xf32>,
    %c256_i32 = arith.constant 256 : i32
    %5 = arith.muli %arg1, %c256_i32 : i32
    %6 = tpu.assume_multiple %5, 128 : i32
    %c0_5 = arith.constant 0 : index
    %7 = arith.index_cast %6 : i32 to index
    %8 = vector.load %arg3[%c0_5, %7] : memref<50x256xf32, #tpu.memory_space<vmem>>, vector<50x256xf32>
    %c0_6 = arith.constant 0 : index
    %c0_7 = arith.constant 0 : index
    %c0_8 = arith.constant 0 : index
    %9 = vector.load %arg4[%c0_6, %c0_7, %c0_8] : memref<1x16x50xf32, #tpu.memory_space<vmem>>, vector<1x16x50xf32>
    %10 = vector.shape_cast %9 : vector<1x16x50xf32> to vector<16x50xf32>
    %cst = arith.constant dense<0.000000e+00> : vector<16x256xf32>
    %11 = tpu.matmul %10, %8, %cst {dimension_numbers = #tpu.dot_dimension_numbers<[1], [0], [0], [1], [0, 0, 1, 1], [], []>} : vector<16x50xf32>, vector<50x256xf32>, vector<16x256xf32> -> vector<16x256xf32>
    %c0_9 = arith.constant 0 : index
    %c16 = arith.constant 16 : index
    %c0_10 = arith.constant 0 : index
    %12 = vector.load %arg5[%c0_9, %c16, %c0_10] : memref<1x32x256xf32, #tpu.memory_space<vmem>>, vector<1x16x256xf32>
    %13 = vector.shape_cast %12 : vector<1x16x256xf32> to vector<16x256xf32>
    %14 = vector.shape_cast %11 : vector<16x256xf32> to vector<1x16x256xf32>
    tpu.vector_store %arg5[%c0_9, %c16, %c0_10], %14 {strides = array<i32>} : memref<1x32x256xf32, #tpu.memory_space<vmem>>, vector<1x16x256xf32>,
    return
  }
  func.func @transform_0(%arg0: i32, %arg1: i32) -> (i32, i32, i32) {
    %c0_i32 = arith.constant 0 : i32
    %c0_i32_0 = arith.constant 0 : i32
    return %arg0, %c0_i32, %arg1 : i32, i32, i32
  }
  func.func @transform_1(%arg0: i32, %arg1: i32) -> (i32, i32) {
    %c0_i32 = arith.constant 0 : i32
    %c0_i32_0 = arith.constant 0 : i32
    %c0_i32_1 = arith.constant 0 : i32
    return %c0_i32, %c0_i32_0 : i32, i32
  }
  func.func @transform_2(%arg0: i32, %arg1: i32) -> (i32, i32, i32) {
    %c0_i32 = arith.constant 0 : i32
    %c0_i32_0 = arith.constant 0 : i32
    %c0_i32_1 = arith.constant 0 : i32
    return %arg0, %c0_i32, %c0_i32_0 : i32, i32, i32
  }
  func.func @transform_3(%arg0: i32, %arg1: i32) -> (i32, i32, i32) {
    %c0_i32 = arith.constant 0 : i32
    %c0_i32_0 = arith.constant 0 : i32
    return %arg0, %c0_i32, %arg1 : i32, i32, i32
  }
}

</mosaic_0001>

<bundles_post_ra>
// kernel: psp_forward_pallas.1
= control target key start
LH: loop header
LB: loop body
LE: loop exit
PB: predicated region body
PF: predicated region fallthrough
CT: control target
= control target key end

     0   :  { %s559_s12 = smov 0   ;;  %s561_s13 = smov 0   ;;  %s652_s0 = inlined_call_operand.vmem [shape: f32[2,16,256], index: 0, kind: input, shape index: {}]   ;;  %s653_s1 = inlined_call_operand.vmem [shape: f32[50,256], index: 1, kind: input, shape index: {}]   ;;  %s654_s2 = inlined_call_operand.vmem [shape: f32[2,16,50], index: 2, kind: input, shape index: {}]   ;;  %s655_s3 = inlined_call_operand.vmem [shape: f32[2,32,256], index: 3, kind: output, shape index: {}]  }
   0x1   :  { %s563_s14 = smov 0  }
   0x2 LB: > { %s25_s15 = sadd.s32 1, %s532_s13  ;;  %p459_p0 = scmp.ge.s32.totalorder %s536_s14, 1  ;;  %s536_s14 = sphi %s563_s14, %s13_s14   ;;  %s532_s13 = sphi %s561_s13, %s657_s13   ;;  %s528_s12 = sphi %s559_s12, %s656_s12  }
   0x3   : > { %p27_p1 = scmp.ge.s32.totalorder %s25_s15, 2  ;;  %p168_p2 = scmp.lt.s32.totalorder %s536_s14, 3 }
   0x5   : > { %s659_s15 = smov (%p27_p1, %s25_s15), 0  ;;  %p169_p3 = pnand %p459_p0, %p168_p2 }
   0x6   : > { %p206_p4 = scmp.lt.s32.totalorder (!%p169_p3), %s528_s12, 1 }
   0x7   : > { %172 = sbr.rel (%p169_p3) target bundleno = 224 (0xe0), region = 32 }
   0xc   : > { %v256_v0 = vld [vmem:[%s653_s1 + $0x68] sm:$0x3]  ;;  %vm266_vm0 = vcmask 1041408   ;;  %v255_v1 = vld [vmem:[%s653_s1 + $0x60] sm:$0x3]  ;;  %v254_v2 = vld [vmem:[%s653_s1 + $0x58] sm:$0xff] }
   0xd   : > { %466 = vmatprep.subr.msk.mxu0 %vm266_vm0, %v256_v0  ;;  %475 = vmatprep.subr.msk.mxu1 %vm266_vm0, %v256_v0  ;;  %v253_v3 = vld [vmem:[%s653_s1 + $0x50] sm:$0xff]  ;;  %v252_v4 = vld [vmem:[%s653_s1 + $0x48] sm:$0xff]  ;;  %v251_v5 = vld [vmem:[%s653_s1 + $0x40] sm:$0xff]  ;;  %s661_s12 = smov (!%p206_p4, %s528_s12), 1  ;;  %vm259_vm1 = vcmask 408576   ;;  %v538_v20 = vmov 0.0  }
   0xe   : > { %467 = vmatpush1.msk.msra.mxu0 %vm266_vm0, %v255_v1  ;;  %482 = vmatpush1.msk.msra.mxu1 %vm266_vm0, %v255_v1  ;;  %v250_v6 = vld [vmem:[%s653_s1 + $0x38] sm:$0xff]  ;;  %v249_v7 = vld [vmem:[%s653_s1 + $0x30] sm:$0xff]  ;;  %s472_s5 = sshll.u32 %s661_s12, 5  ;;  %v248_v8 = vld [vmem:[%s653_s1 + $0x28] sm:$0xff]  ;;  %s473_s17 = sshll.u32 %s661_s12, 4 }
   0xf   : > { %293 = vmatprep.subr.mxu0 %v254_v2  ;;  %476 = vmatprep.subr.mxu1 %v254_v2  ;;  %v247_v9 = vld [vmem:[%s653_s1 + $0x20] sm:$0xff]  ;;  %s213_s16 = scalar_lea.vmem %s652_s0, %s472_s5  ;;  %s474_s18 = sshll.u32 %s661_s12, 6  ;;  %v246_v13 = vld [vmem:[%s653_s1 + $0x18] sm:$0xff]  ;;  %v245_v15 = vld [vmem:[%s653_s1 + $0x10] sm:$0xff] }
  0x10   : > { %294 = vmatpush1.msra.mxu0 %v253_v3  ;;  %483 = vmatpush1.msra.mxu1 %v253_v3  ;;  %v230_v10 = vld [vmem:[%s213_s16] sm:$0xff]  ;;  %v231_v11 = vld [vmem:[%s213_s16 + $0x8] sm:$0xff]  ;;  %v232_v12 = vld [vmem:[%s213_s16 + $0x10] sm:$0xff]  ;;  %s621_s23 = scalar_lea.vmem %s655_s3, %s474_s18  ;;  %s219_s29 = scalar_lea.vmem %s654_s2, %s473_s17 }
  0x11   : > { %295 = vmatprep.subr.mxu0 %v252_v4  ;;  %477 = vmatprep.subr.mxu1 %v252_v4  ;;  %v233_v14 = vld [vmem:[%s213_s16 + $0x18] sm:$0xff]  ;;  %234 = vst [vmem:[%s621_s23] sm:$0xff] %v230_v10  ;;  %235 = vst [vmem:[%s621_s23 + $0x8] sm:$0xff] %v231_v11  ;;  %v244_v16 = vld [vmem:[%s653_s1 + $0x8] sm:$0xff] }
  0x12   : > { %296 = vmatpush1.msra.mxu0 %v251_v5  ;;  %484 = vmatpush1.msra.mxu1 %v251_v5  ;;  %236 = vst [vmem:[%s621_s23 + $0x10] sm:$0xff] %v232_v12  ;;  %237 = vst [vmem:[%s621_s23 + $0x18] sm:$0xff] %v233_v14  ;;  %v243_v17 = vld [vmem:[%s653_s1] sm:$0xff]  ;;  %v258_v19 = vld [vmem:[%s219_s29 + $0x8] sm:$0xff] }
  0x13   : > { %297 = vmatprep.subr.mxu0 %v250_v6  ;;  %478 = vmatprep.subr.mxu1 %v250_v6  ;;  %v257_v18 = vld [vmem:[%s219_s29] sm:$0xff] }
  0x14   : > { %298 = vmatpush1.msra.mxu0 %v249_v7  ;;  %485 = vmatpush1.msra.mxu1 %v249_v7 }
  0x15   : > { %299 = vmatprep.subr.mxu0 %v248_v8  ;;  %479 = vmatprep.subr.mxu1 %v248_v8 }
  0x16   : > { %300 = vmatpush1.msra.mxu0 %v247_v9  ;;  %486 = vmatpush1.msra.mxu1 %v247_v9 }
  0x17   : > { %301 = vmatprep.subr.mxu0 %v246_v13  ;;  %480 = vmatprep.subr.mxu1 %v246_v13 }
  0x18   : > { %302 = vmatpush1.msra.mxu0 %v245_v15  ;;  %487 = vmatpush1.msra.mxu1 %v245_v15 }
  0x19   : > { %303 = vmatprep.subr.mxu0 %v244_v16  ;;  %481 = vmatprep.subr.mxu1 %v244_v16 }
  0x1a   : > { %304 = vmatpush1.msra.mxu0 %v243_v17  ;;  %488 = vmatpush1.msra.mxu1 %v243_v17 }
  0x1b   : > { %337 = vmatprep.mubr.f32.mxu0 %v538_v20  ;;  %343 = vmatprep.mubr.f32.mxu1 %v538_v20 }
  0x1c   : > { %468 = vmatmul.mubr.msk.f32.vlgmr.msra.gmra.mxu0 %vm259_vm1, %v257_v18  ;;  %469 = vmatmul.mubr.msk.f32.vlgmr.msra.gmra.mxu1 %vm259_vm1, %v258_v19 }
  0xdc   : > { %v339_v21 = vpop.f32.mrf.mxu0  ;;  %v345_v22 = vpop.f32.mrf.mxu1 }
  0xdd   : > { %350 = vst [vmem:[%s621_s23 + $0x20] sm:$0xff] %v339_v21  ;;  %352 = vst [vmem:[%s621_s23 + $0x30] sm:$0xff] %v345_v22 }
  0xde   : > { %v341_v23 = vpop.f32.mrf.mxu0  ;;  %v347_v24 = vpop.f32.mrf.mxu1 }
  0xdf   : > { %351 = vst [vmem:[%s621_s23 + $0x28] sm:$0xff] %v341_v23  ;;  %353 = vst [vmem:[%s621_s23 + $0x38] sm:$0xff] %v347_v24 }
  0xe0 PF: > { %s13_s14 = sadd.s32 1, %s536_s14   ;;  %s656_s12 = smov %s532_s13 }
  0xe1   : > { %p10_p5 = scmp.ge.s32.totalorder %s13_s14, 4   ;;  %s657_s13 = smov %s659_s15 }
  0xe3   :  { %12 = sbr.rel (!%p10_p5) target bundleno = 2 (0x2), region = 66 }

</bundles_post_ra>
